<compile_context>
chip_gen: v5e
topology: v5e:2x2
jax: 0.10.0
libtpu: 0.0.40
codegen_flags: <defaults>
</compile_context>

<pallas_src>
import jax
import jax.numpy as jnp
from jax import lax
from jax.experimental import pallas as pl
from jax.experimental.pallas import tpu as pltpu

STATNUM = 32   # statnum (input feature dim) — synthetic choice
HIDDEN = 64
LN_EPS = 1e-5  # PyTorch nn.LayerNorm default eps


def _round_up(n, m):
    return (n + m - 1) // m * m


def _ln_relu(h, gamma, beta, mred):
    """LayerNorm(HIDDEN) + ReLU with both row reductions done on the MXU.

    `mred` is a (HIDDEN, HIDDEN) matrix filled with 1/HIDDEN, so jnp.dot(h, mred)
    is the per-row mean of h replicated across all lanes — no XLU cross-lane
    reduce and no lane-broadcast relayout when it is consumed below.
    """
    mu = jnp.dot(h, mred, preferred_element_type=jnp.float32)
    msq = jnp.dot(h * h, mred, preferred_element_type=jnp.float32)
    var = msq - mu * mu                  # one-pass variance (f32)
    inv = lax.rsqrt(var + LN_EPS)        # EUP; already lane-replicated
    return jnp.maximum((h - mu) * inv * gamma + beta, 0.0)


def modelv_kernel(x_ref, w1_ref, w2_ref, mred_ref, w3_ref, p_ref, o_ref):
    # Packed small params (VMEM-resident): rows are
    #   0:b1  1:g1  2:be1  3:b2  4:g2  5:be2  6:b3(broadcast)  7:pad
    p = p_ref[...]                       # (8, HIDDEN) f32
    b1, g1, be1 = p[0:1, :], p[1:2, :], p[2:3, :]
    b2, g2, be2 = p[3:4, :], p[4:5, :], p[5:6, :]
    b3 = p[6:7, 0:1]                     # (1, 1)
    mred = mred_ref[...]                 # (HIDDEN, HIDDEN) = 1/HIDDEN

    # Linear(statnum, 64): bf16 feed to the MXU, f32 accumulation.
    xb = x_ref[...].astype(w1_ref.dtype)
    h = jnp.dot(xb, w1_ref[...], preferred_element_type=jnp.float32) + b1
    h = _ln_relu(h, g1, be1, mred)       # LN/ReLU stay f32 (no bf16 VALU on v5e)

    # Linear(64, 64)
    h = jnp.dot(h.astype(w2_ref.dtype), w2_ref[...],
                preferred_element_type=jnp.float32) + b2
    h = _ln_relu(h, g2, be2, mred)

    # Dropout(0.1): identity (eval-mode semantics).
    # TODO(synk): training-mode dropout RNG has no clean Pallas equivalent here.

    # Final Linear(64, 1): MXU matvec (keeps the last lane reduction off the XLU).
    out = jnp.dot(h, w3_ref[...], preferred_element_type=jnp.float32) + b3
    o_ref[...] = out.astype(o_ref.dtype)


def _vmem_limit_bytes(tb, feat, x_itemsize):
    live_f32 = 12  # conservative count of simultaneously-live (TB, HIDDEN) f32 temps
    est = (2 * tb * feat * x_itemsize        # double-buffered x tile
           + 2 * tb * 4                      # double-buffered output column
           + live_f32 * tb * HIDDEN * 4      # kernel-internal f32 working set
           + (1 << 19))                      # resident weights + slack
    est = int(est * 1.4)
    # Floor below every generation's default scoped limit; ceiling at v7x's
    # 64 MiB physical VMEM (default block_b=8192 lands around ~37 MiB).
    return max(32 << 20, min(est, 64 << 20))


def _resident(i):            # constant index_map -> block stays VMEM-resident
    return (0, 0)


def modelv_forward(x, params, *, block_b=8192, min_tiles=8,
                   matmul_dtype=jnp.bfloat16):
    """Fused forward pass.

    block_b   : target batch tile (rows per grid step); sweep 4096-16384.
    min_tiles : keep at least this many grid steps so v7x's two TensorCores both
                get work under dimension_semantics=("parallel",).
    x may be float32 or bfloat16; it is cast to `matmul_dtype` inside the kernel.
    """
    B, F = x.shape
    w1 = params["w1"]
    assert F == w1.shape[0], (F, w1.shape)

    # Batch tile: large enough to amortize per-grid-step overhead, small enough
    # to keep >= min_tiles grid steps and to stay within the VMEM budget.
    TB = min(_round_up(block_b, 8),
             _round_up(pl.cdiv(B, min_tiles), 8),
             _round_up(B, 8))
    TB = max(TB, 8)
    # Ragged last block (no host-side jnp.pad): garbage tail-row reads only feed
    # output rows whose writes are masked by Pallas.
    grid = (pl.cdiv(B, TB),)

    w1b = w1.astype(matmul_dtype)                    # (F, HIDDEN)
    w2b = params["w2"].astype(matmul_dtype)          # (HIDDEN, HIDDEN)
    w3 = params["w3"].astype(jnp.float32)            # (HIDDEN, 1)
    mred = jnp.full((HIDDEN, HIDDEN), 1.0 / HIDDEN, jnp.float32)
    pvec = jnp.stack([
        params["b1"], params["g1"], params["be1"],
        params["b2"], params["g2"], params["be2"],
        jnp.full((HIDDEN,), params["b3"][0], jnp.float32),
        jnp.zeros((HIDDEN,), jnp.float32),
    ], axis=0).astype(jnp.float32)                   # (8, HIDDEN)

    in_specs = [
        pl.BlockSpec((TB, F), lambda i: (i, 0)),     # x: tiled over batch
        pl.BlockSpec((F, HIDDEN), _resident),        # w1
        pl.BlockSpec((HIDDEN, HIDDEN), _resident),   # w2
        pl.BlockSpec((HIDDEN, HIDDEN), _resident),   # mean reducer (1/HIDDEN)
        pl.BlockSpec((HIDDEN, 1), _resident),        # w3 column
        pl.BlockSpec((8, HIDDEN), _resident),        # packed small params
    ]
    out = pl.pallas_call(
        modelv_kernel,
        grid=grid,
        in_specs=in_specs,
        out_specs=pl.BlockSpec((TB, 1), lambda i: (i, 0)),
        out_shape=jax.ShapeDtypeStruct((B, 1), jnp.float32),
        compiler_params=pltpu.CompilerParams(
            dimension_semantics=("parallel",),
            vmem_limit_bytes=_vmem_limit_bytes(TB, F, x.dtype.itemsize)),
    )(x, w1b, w2b, mred, w3, pvec)
    return out


def init_params(key):
    # PyTorch nn.Linear default init: U(-1/sqrt(fan_in), 1/sqrt(fan_in)).
    # nn.LayerNorm default: gamma=1, beta=0.
    ks = jax.random.split(key, 6)

    def lin(kw, kb, fan_in, fan_out):
        bound = 1.0 / jnp.sqrt(fan_in)
        w = jax.random.uniform(kw, (fan_in, fan_out), jnp.float32, -bound, bound)
        b = jax.random.uniform(kb, (fan_out,), jnp.float32, -bound, bound)
        return w, b

    w1, b1 = lin(ks[0], ks[1], STATNUM, HIDDEN)
    w2, b2 = lin(ks[2], ks[3], HIDDEN, HIDDEN)
    w3, b3 = lin(ks[4], ks[5], HIDDEN, 1)            # w3: (64, 1), b3: (1,)
    g = jnp.ones((HIDDEN,), jnp.float32)
    be = jnp.zeros((HIDDEN,), jnp.float32)
    return {
        "w1": w1, "b1": b1, "g1": g, "be1": be,
        "w2": w2, "b2": b2, "g2": g, "be2": be,
        "w3": w3, "b3": b3,
    }


def _reference(x, p, matmul_dtype=jnp.float32):
    """Pure-JAX reference. matmul_dtype=bf16 mirrors the kernel's MXU feed."""
    def ln(h, g, be):
        mu = jnp.mean(h, axis=-1, keepdims=True)
        var = jnp.mean((h - mu) ** 2, axis=-1, keepdims=True)
        return (h - mu) / jnp.sqrt(var + LN_EPS) * g + be

    def mm(a, w):
        return jnp.dot(a.astype(matmul_dtype), w.astype(matmul_dtype),
                       preferred_element_type=jnp.float32)

    h = jnp.maximum(ln(mm(x, p["w1"]) + p["b1"], p["g1"], p["be1"]), 0.0)
    h = jnp.maximum(ln(mm(h, p["w2"]) + p["b2"], p["g2"], p["be2"]), 0.0)
    return jnp.dot(h, p["w3"], preferred_element_type=jnp.float32) + p["b3"]


if __name__ == "__main__":
    key = jax.random.PRNGKey(0)
    kx, kp = jax.random.split(key)

    B = 200  # not a multiple of the tile -> exercises the ragged (masked) last block
    x = jax.random.normal(kx, (B, STATNUM), jnp.float32)
    params = init_params(kp)

    # At B=200 the min_tiles=8 cap gives TB=32 -> grid of 7 tiles (last one partial).
    out = modelv_forward(x, params)
    out = jax.block_until_ready(out)
    assert out.shape == (B, 1), out.shape
    assert bool(jnp.all(jnp.isfinite(out))), "non-finite values in kernel output"

    # Check against a reference that mirrors the kernel's bf16 main-matmul feed
    # (LN reductions in the kernel are f32-fed MXU matmuls).
    ref_bf16 = _reference(x, params, jnp.bfloat16)
    err_bf16 = float(jnp.max(jnp.abs(out - ref_bf16)))
    assert err_bf16 < 3e-2, f"max abs err vs bf16-emulated reference: {err_bf16}"

    # Loose sanity check against full-f32 math (bf16 MXU feed costs ~1e-3 abs).
    ref_f32 = _reference(x, params, jnp.float32)
    err_f32 = float(jnp.max(jnp.abs(out - ref_f32)))
    assert err_f32 < 5e-2, f"max abs err vs f32 reference: {err_f32}"

    print("KERNEL_OK")
</pallas_src>

<mosaic_0001>
module attributes {stable_mosaic.version = 11 : i64} {
  func.func @modelv_kernel(%arg0: i32, %arg1: memref<32x32xf32, #tpu.memory_space<vmem>>, %arg2: memref<32x64xbf16, #tpu.memory_space<vmem>>, %arg3: memref<64x64xbf16, #tpu.memory_space<vmem>>, %arg4: memref<64x64xf32, #tpu.memory_space<vmem>>, %arg5: memref<64x1xf32, #tpu.memory_space<vmem>>, %arg6: memref<8x64xf32, #tpu.memory_space<vmem>>, %arg7: memref<32x1xf32, #tpu.memory_space<vmem>>) attributes {dimension_semantics = [#tpu.dimension_semantics<parallel>], iteration_bounds = array<i64: 7>, scalar_prefetch = 0 : i64, scratch_operands = 0 : i64, tpu.core_type = #tpu.core_type<tc>, window_params = [{transform_indices = @transform_0, window_bounds = array<i64: 32, 32>}, {pipeline_mode = #tpu.pipeline_mode<synchronous>, transform_indices = @transform_1, window_bounds = array<i64: 32, 64>}, {pipeline_mode = #tpu.pipeline_mode<synchronous>, transform_indices = @transform_2, window_bounds = array<i64: 64, 64>}, {pipeline_mode = #tpu.pipeline_mode<synchronous>, transform_indices = @transform_3, window_bounds = array<i64: 64, 64>}, {pipeline_mode = #tpu.pipeline_mode<synchronous>, transform_indices = @transform_4, window_bounds = array<i64: 64, 1>}, {pipeline_mode = #tpu.pipeline_mode<synchronous>, transform_indices = @transform_5, window_bounds = array<i64: 8, 64>}, {transform_indices = @transform_6, window_bounds = array<i64: 32, 1>}]} {
    %c0 = arith.constant 0 : index
    %c0_0 = arith.constant 0 : index
    %0 = vector.load %arg6[%c0, %c0_0] : memref<8x64xf32, #tpu.memory_space<vmem>>, vector<8x64xf32>
    %1 = vector.extract_strided_slice %0 {offsets = [0, 0], sizes = [1, 64], strides = [1, 1]} : vector<8x64xf32> to vector<1x64xf32>
    %2 = vector.extract_strided_slice %0 {offsets = [1, 0], sizes = [1, 64], strides = [1, 1]} : vector<8x64xf32> to vector<1x64xf32>
    %3 = vector.extract_strided_slice %0 {offsets = [2, 0], sizes = [1, 64], strides = [1, 1]} : vector<8x64xf32> to vector<1x64xf32>
    %4 = vector.extract_strided_slice %0 {offsets = [3, 0], sizes = [1, 64], strides = [1, 1]} : vector<8x64xf32> to vector<1x64xf32>
    %5 = vector.extract_strided_slice %0 {offsets = [4, 0], sizes = [1, 64], strides = [1, 1]} : vector<8x64xf32> to vector<1x64xf32>
    %6 = vector.extract_strided_slice %0 {offsets = [5, 0], sizes = [1, 64], strides = [1, 1]} : vector<8x64xf32> to vector<1x64xf32>
    %7 = vector.extract_strided_slice %0 {offsets = [6, 0], sizes = [1, 1], strides = [1, 1]} : vector<8x64xf32> to vector<1x1xf32>
    %c0_1 = arith.constant 0 : index
    %c0_2 = arith.constant 0 : index
    %8 = vector.load %arg4[%c0_1, %c0_2] : memref<64x64xf32, #tpu.memory_space<vmem>>, vector<64x64xf32>
    %c0_3 = arith.constant 0 : index
    %c0_4 = arith.constant 0 : index
    %9 = vector.load %arg1[%c0_3, %c0_4] : memref<32x32xf32, #tpu.memory_space<vmem>>, vector<32x32xf32>
    %10 = arith.truncf %9 : vector<32x32xf32> to vector<32x32xbf16>
    %c0_5 = arith.constant 0 : index
    %c0_6 = arith.constant 0 : index
    %11 = vector.load %arg2[%c0_5, %c0_6] : memref<32x64xbf16, #tpu.memory_space<vmem>>, vector<32x64xbf16>
    %cst = arith.constant dense<0.000000e+00> : vector<32x64xf32>
    %12 = tpu.matmul %10, %11, %cst {dimension_numbers = #tpu.dot_dimension_numbers<[1], [0], [0], [1], [0, 0, 1, 1], [], []>} : vector<32x32xbf16>, vector<32x64xbf16>, vector<32x64xf32> -> vector<32x64xf32>
    %13 = vector.broadcast %1 : vector<1x64xf32> to vector<32x64xf32>
    %14 = arith.addf %12, %13 : vector<32x64xf32>
    %cst_7 = arith.constant dense<0.000000e+00> : vector<32x64xf32>
    %15 = tpu.matmul %14, %8, %cst_7 {dimension_numbers = #tpu.dot_dimension_numbers<[1], [0], [0], [1], [0, 0, 1, 1], [], []>} : vector<32x64xf32>, vector<64x64xf32>, vector<32x64xf32> -> vector<32x64xf32>
    %16 = arith.mulf %14, %14 : vector<32x64xf32>
    %cst_8 = arith.constant dense<0.000000e+00> : vector<32x64xf32>
    %17 = tpu.matmul %16, %8, %cst_8 {dimension_numbers = #tpu.dot_dimension_numbers<[1], [0], [0], [1], [0, 0, 1, 1], [], []>} : vector<32x64xf32>, vector<64x64xf32>, vector<32x64xf32> -> vector<32x64xf32>
    %18 = arith.mulf %15, %15 : vector<32x64xf32>
    %19 = arith.subf %17, %18 : vector<32x64xf32>
    %cst_9 = arith.constant 9.99999974E-6 : f32
    %20 = vector.broadcast %cst_9 : f32 to vector<32x64xf32>
    %21 = arith.addf %19, %20 : vector<32x64xf32>
    %22 = math.rsqrt %21 : vector<32x64xf32>
    %23 = arith.subf %14, %15 : vector<32x64xf32>
    %24 = arith.mulf %23, %22 : vector<32x64xf32>
    %25 = vector.broadcast %2 : vector<1x64xf32> to vector<32x64xf32>
    %26 = arith.mulf %24, %25 : vector<32x64xf32>
    %27 = vector.broadcast %3 : vector<1x64xf32> to vector<32x64xf32>
    %28 = arith.addf %26, %27 : vector<32x64xf32>
    %cst_10 = arith.constant 0.000000e+00 : f32
    %29 = vector.broadcast %cst_10 : f32 to vector<32x64xf32>
    %30 = arith.maximumf %28, %29 : vector<32x64xf32>
    %31 = arith.truncf %30 : vector<32x64xf32> to vector<32x64xbf16>
    %c0_11 = arith.constant 0 : index
    %c0_12 = arith.constant 0 : index
    %32 = vector.load %arg3[%c0_11, %c0_12] : memref<64x64xbf16, #tpu.memory_space<vmem>>, vector<64x64xbf16>
    %cst_13 = arith.constant dense<0.000000e+00> : vector<32x64xf32>
    %33 = tpu.matmul %31, %32, %cst_13 {dimension_numbers = #tpu.dot_dimension_numbers<[1], [0], [0], [1], [0, 0, 1, 1], [], []>} : vector<32x64xbf16>, vector<64x64xbf16>, vector<32x64xf32> -> vector<32x64xf32>
    %34 = vector.broadcast %4 : vector<1x64xf32> to vector<32x64xf32>
    %35 = arith.addf %33, %34 : vector<32x64xf32>
    %cst_14 = arith.constant dense<0.000000e+00> : vector<32x64xf32>
    %36 = tpu.matmul %35, %8, %cst_14 {dimension_numbers = #tpu.dot_dimension_numbers<[1], [0], [0], [1], [0, 0, 1, 1], [], []>} : vector<32x64xf32>, vector<64x64xf32>, vector<32x64xf32> -> vector<32x64xf32>
    %37 = arith.mulf %35, %35 : vector<32x64xf32>
    %cst_15 = arith.constant dense<0.000000e+00> : vector<32x64xf32>
    %38 = tpu.matmul %37, %8, %cst_15 {dimension_numbers = #tpu.dot_dimension_numbers<[1], [0], [0], [1], [0, 0, 1, 1], [], []>} : vector<32x64xf32>, vector<64x64xf32>, vector<32x64xf32> -> vector<32x64xf32>
    %39 = arith.mulf %36, %36 : vector<32x64xf32>
    %40 = arith.subf %38, %39 : vector<32x64xf32>
    %cst_16 = arith.constant 9.99999974E-6 : f32
    %41 = vector.broadcast %cst_16 : f32 to vector<32x64xf32>
    %42 = arith.addf %40, %41 : vector<32x64xf32>
    %43 = math.rsqrt %42 : vector<32x64xf32>
    %44 = arith.subf %35, %36 : vector<32x64xf32>
    %45 = arith.mulf %44, %43 : vector<32x64xf32>
    %46 = vector.broadcast %5 : vector<1x64xf32> to vector<32x64xf32>
    %47 = arith.mulf %45, %46 : vector<32x64xf32>
    %48 = vector.broadcast %6 : vector<1x64xf32> to vector<32x64xf32>
    %49 = arith.addf %47, %48 : vector<32x64xf32>
    %cst_17 = arith.constant 0.000000e+00 : f32
    %50 = vector.broadcast %cst_17 : f32 to vector<32x64xf32>
    %51 = arith.maximumf %49, %50 : vector<32x64xf32>
    %c0_18 = arith.constant 0 : index
    %c0_19 = arith.constant 0 : index
    %52 = vector.load %arg5[%c0_18, %c0_19] : memref<64x1xf32, #tpu.memory_space<vmem>>, vector<64x1xf32>
    %cst_20 = arith.constant dense<0.000000e+00> : vector<32x1xf32>
    %53 = tpu.matmul %51, %52, %cst_20 {dimension_numbers = #tpu.dot_dimension_numbers<[1], [0], [0], [1], [0, 0, 1, 1], [], []>} : vector<32x64xf32>, vector<64x1xf32>, vector<32x1xf32> -> vector<32x1xf32>
    %54 = vector.broadcast %7 : vector<1x1xf32> to vector<32x1xf32>
    %55 = arith.addf %53, %54 : vector<32x1xf32>
    %c0_21 = arith.constant 0 : index
    %c0_22 = arith.constant 0 : index
    %56 = vector.load %arg7[%c0_21, %c0_22] : memref<32x1xf32, #tpu.memory_space<vmem>>, vector<32x1xf32>
    tpu.vector_store %arg7[%c0_21, %c0_22], %55 {strides = array<i32>} : memref<32x1xf32, #tpu.memory_space<vmem>>, vector<32x1xf32>,
    return
  }
  func.func @transform_0(%arg0: i32) -> (i32, i32) {
    %c0_i32 = arith.constant 0 : i32
    %c0_i32_0 = arith.constant 0 : i32
    return %arg0, %c0_i32 : i32, i32
  }
  func.func @transform_1(%arg0: i32) -> (i32, i32) {
    %c0_i32 = arith.constant 0 : i32
    %c0_i32_0 = arith.constant 0 : i32
    %c0_i32_1 = arith.constant 0 : i32
    return %c0_i32, %c0_i32_0 : i32, i32
  }
  func.func @transform_2(%arg0: i32) -> (i32, i32) {
    %c0_i32 = arith.constant 0 : i32
    %c0_i32_0 = arith.constant 0 : i32
    %c0_i32_1 = arith.constant 0 : i32
    return %c0_i32, %c0_i32_0 : i32, i32
  }
  func.func @transform_3(%arg0: i32) -> (i32, i32) {
    %c0_i32 = arith.constant 0 : i32
    %c0_i32_0 = arith.constant 0 : i32
    %c0_i32_1 = arith.constant 0 : i32
    return %c0_i32, %c0_i32_0 : i32, i32
  }
  func.func @transform_4(%arg0: i32) -> (i32, i32) {
    %c0_i32 = arith.constant 0 : i32
    %c0_i32_0 = arith.constant 0 : i32
    %c0_i32_1 = arith.constant 0 : i32
    return %c0_i32, %c0_i32_0 : i32, i32
  }
  func.func @transform_5(%arg0: i32) -> (i32, i32) {
    %c0_i32 = arith.constant 0 : i32
    %c0_i32_0 = arith.constant 0 : i32
    %c0_i32_1 = arith.constant 0 : i32
    return %c0_i32, %c0_i32_0 : i32, i32
  }
  func.func @transform_6(%arg0: i32) -> (i32, i32) {
    %c0_i32 = arith.constant 0 : i32
    %c0_i32_0 = arith.constant 0 : i32
    return %arg0, %c0_i32 : i32, i32
  }
}

</mosaic_0001>

<bundles_post_ra>
// kernel: tpu_custom_call.1
= control target key start
LH: loop header
LB: loop body
LE: loop exit
PB: predicated region body
PF: predicated region fallthrough
CT: control target
= control target key end

     0   :  { %s1320_s21 = smov 0   ;;  %s1322_s22 = smov 0   ;;  %s1570_s0 = inlined_call_operand.vmem [shape: f32[200,32], index: 0, kind: input, shape index: {}]   ;;  %s1571_s1 = inlined_call_operand.vmem [shape: bf16[32,64], index: 1, kind: input, shape index: {}]   ;;  %s1572_s2 = inlined_call_operand.vmem [shape: bf16[64,64], index: 2, kind: input, shape index: {}]   ;;  %s1573_s3 = inlined_call_operand.vmem [shape: f32[64,64], index: 3, kind: input, shape index: {}]   ;;  %s1574_s4 = inlined_call_operand.vmem [shape: f32[64,1], index: 4, kind: input, shape index: {}]   ;;  %s1575_s5 = inlined_call_operand.vmem [shape: f32[8,64], index: 5, kind: input, shape index: {}]   ;;  %s1576_s6 = inlined_call_operand.vmem [shape: f32[200,1], index: 6, kind: output, shape index: {}]  }
   0x1   :  { %s1324_s23 = smov 0  }
   0x2 LB: > { %s1333_s24 = sadd.s32 4294967295, %s1251_s23   ;;  %s1335_s25 = sadd.s32 1, %s1251_s23   ;;  %s1251_s23 = sphi %s1324_s23, %s1583_s23   ;;  %s1247_s22 = sphi %s1322_s22, %s1582_s22   ;;  %s1243_s21 = sphi %s1320_s21, %s1581_s21  }
   0x3   : > { %s151_s26 = ssub.s32 %s1251_s23, %s1335_s25  ;;  %s154_s27 = sadd.s32 1, %s1247_s22 }
   0x4   : > { %p152_p0 = scmp.eq.s32.totalorder %s151_s26, 0  ;;  %p164_p1 = scmp.ne.s32.totalorder %s1247_s22, %s1243_s21 }
   0x5   : > { %p165_p2 = scmp.eq.s32.totalorder %s1333_s24, 6  ;;  %p999_p3 = scmp.ge.s32.totalorder %s1251_s23, 1 }
   0x6   : > { %s1343_s28 = scalar_select %p152_p0, %s1247_s22, %s154_s27  }
   0x7   : > { %p1345_p4 = por %p165_p2, %p164_p1  ;;  %p221_p5 = scmp.lt.s32.totalorder %s1251_s23, 8 }
   0x9   : > { %p222_p6 = pnand %p999_p3, %p221_p5 }
   0xa   : > { %s1353_s8 = sshll.u32 (!%p222_p6), %s1333_s24, 2  ;;  %s251_s30 = sand.u32 (!%p222_p6), 1, %s1243_s21  }
   0xb   : > { %225 = sbr.rel (%p222_p6) target bundleno = 819 (0x333), region = 44  ;;  %p259_p7 = scmp.lt.s32.totalorder (!%p222_p6), %s1353_s8, 24 }
   0xc   : > { %s1000_s7 = sshll.u32 (!%p222_p6), %s251_s30, 5 }
   0xd   : > { %s1508_s9 = scalar_lea.vmem (!%p222_p6), [#allocation2], %s1000_s7  }
  0x10   : > { %v1069_v0 = vld [vmem:[%s1571_s1 + $0x8] sm:$0xff]  ;;  %v282_v1 = vld [vmem:[%s1573_s3 + $0x38] sm:$0xff]  ;;  %v281_v2 = vld [vmem:[%s1573_s3 + $0x30] sm:$0xff]  ;;  %s260_s17 = scalar_select %p259_p7, %s1353_s8, 24  ;;  %vm306_vm0 = vcmask 261120   ;;  %vm332_vm1 = vcmask 523264  }
  0x11   : > { %353 = vmatpush.msra.mxu1 %v282_v1  ;;  %398 = vmatpush.msra.mxu2 %v282_v1  ;;  %v1068_v3 = vld [vmem:[%s1571_s1] sm:$0xff]  ;;  %v280_v4 = vld [vmem:[%s1573_s3 + $0x28] sm:$0xff]  ;;  %v278_v6 = vld [vmem:[%s1573_s3 + $0x18] sm:$0xff]  ;;  %s776_s21 = ssub.s32 (%p1345_p4), 25, %s1353_s8  ;;  %s1074_s10 = sshll.u32 (%p1345_p4), %s1333_s24, 5 }
  0x12   : > { %319 = vmatpush.bf16.msra.mxu0 %v1069_v0  ;;  %1077 = vmatpush.msra.mxu3 %v282_v1  ;;  %v279_v5 = vld [vmem:[%s1573_s3 + $0x20] sm:$0xff]  ;;  %s1002_s20 = sshll.u32 %s260_s17, 3  ;;  %v277_v10 = vld [vmem:[%s1573_s3 + $0x10] sm:$0xff]  ;;  %v276_v14 = vld [vmem:[%s1573_s3 + $0x8] sm:$0xff]  ;;  %p777_p8 = scmp.lt.s32.totalorder (%p1345_p4), %s776_s21, 4 }
  0x13   : > { %354 = vmatpush.msra.mxu1 %v281_v2  ;;  %399 = vmatpush.msra.mxu2 %v281_v2  ;;  %s262_s27 = scalar_lea.vmem %s1570_s0, %s1002_s20  ;;  %v275_v15 = vld [vmem:[%s1573_s3] sm:$0xff]  ;;  %v1073_v30 = vld [vmem:[%s1572_s2 + $0x18] sm:$0xff]  ;;  %v1072_v32 = vld [vmem:[%s1572_s2 + $0x10] sm:$0xff]  ;;  %s1521_s13 = scalar_lea.vmem (%p1345_p4), %s1576_s6, %s1074_s10  }
  0x14   : > { %1078 = vmatpush.msra.mxu3 %v281_v2  ;;  %v283_v7 = vld [vmem:[%s262_s27] sm:$0xff]  ;;  %v284_v8 = vld [vmem:[%s262_s27 + $0x8] sm:$0xff]  ;;  %v285_v11 = vld [vmem:[%s262_s27 + $0x10] sm:$0xff] }
  0x15   : > { %355 = vmatpush.msra.mxu1 %v280_v4  ;;  %400 = vmatpush.msra.mxu2 %v280_v4  ;;  %v287_v9 = vpack.c.bf16 %v284_v8, %v283_v7  ;;  %v286_v12 = vld [vmem:[%s262_s27 + $0x18] sm:$0xff]  ;;  %v1392_v16 = vld [vmem:[%s1575_s5] sm:$0xff]  ;;  %v1071_v35 = vld [vmem:[%s1572_s2 + $0x8] sm:$0xff] }
  0x16   : > { %320 = vmatpush.bf16.msra.mxu0 %v1068_v3  ;;  %1079 = vmatpush.msra.mxu3 %v280_v4  ;;  %v288_v13 = vpack.c.bf16 %v286_v12, %v285_v11  ;;  %v293_v17 = vperm.slane %v1392_v16, 0  ;;  %v1070_v39 = vld [vmem:[%s1572_s2] sm:$0xff] }
  0x17   : > { %356 = vmatpush.msra.mxu1 %v279_v5  ;;  %401 = vmatpush.msra.mxu2 %v279_v5 }
  0x18   : > { %1080 = vmatpush.msra.mxu3 %v279_v5 }
  0x19   : > { %357 = vmatpush.msra.mxu1 %v278_v6  ;;  %402 = vmatpush.msra.mxu2 %v278_v6 }
  0x1a   : > { %573 = vmatpush.msrb.mxu0 %v282_v1  ;;  %1081 = vmatpush.msra.mxu3 %v278_v6 }
  0x1b   : > { %1011 = vmatmul.msk.bf16.vlgmr.msra.gmra.mxu0 %vm306_vm0, %v287_v9  ;;  %358 = vmatpush.msra.mxu1 %v277_v10 }
  0x1c   : > { %403 = vmatpush.msra.mxu2 %v277_v10  ;;  %1082 = vmatpush.msra.mxu3 %v277_v10 }
  0x1d   : > { %574 = vmatpush.msrb.mxu0 %v281_v2  ;;  %359 = vmatpush.msra.mxu1 %v276_v14 }
  0x1e   : > { %404 = vmatpush.msra.mxu2 %v276_v14  ;;  %1083 = vmatpush.msra.mxu3 %v276_v14 }
  0x1f   : > { %575 = vmatpush.msrb.mxu0 %v280_v4  ;;  %360 = vmatpush.msra.mxu1 %v275_v15 }
  0x20   : > { %405 = vmatpush.msra.mxu2 %v275_v15  ;;  %1084 = vmatpush.msra.mxu3 %v275_v15 }
  0x21   : > { %576 = vmatpush.msrb.mxu0 %v279_v5  ;;  %618 = vmatpush.msrb.mxu1 %v282_v1  ;;  %v479_v1 = vperm.slane %v1392_v16, 1 }
  0x22   : > { %538 = vmatpush.bf16.msrb.mxu3 %v1073_v30 }
  0x23   : > { %577 = vmatpush.msrb.mxu0 %v278_v6  ;;  %619 = vmatpush.msrb.mxu1 %v281_v2 }
  0x25   : > { %578 = vmatpush.msrb.mxu0 %v277_v10  ;;  %620 = vmatpush.msrb.mxu1 %v280_v4 }
  0x26   : > { %539 = vmatpush.bf16.msrb.mxu3 %v1072_v32 }
  0x27   : > { %579 = vmatpush.msrb.mxu0 %v276_v14  ;;  %621 = vmatpush.msrb.mxu1 %v279_v5 }
  0x29   : > { %580 = vmatpush.msrb.mxu0 %v275_v15  ;;  %622 = vmatpush.msrb.mxu1 %v278_v6 }
  0x2a   : > { %540 = vmatpush.bf16.msrb.mxu3 %v1071_v35 }
  0x2b   : > { %1012 = vmatmul.msk.bf16.gmra.mxu0 %vm306_vm0, %v288_v13  ;;  %623 = vmatpush.msrb.mxu1 %v277_v10  ;;  %v484_v10 = vperm.slane %v1392_v16, 2 }
  0x2d   : > { %624 = vmatpush.msrb.mxu1 %v276_v14 }
  0x2e   : > { %541 = vmatpush.bf16.msrb.mxu3 %v1070_v39 }
  0x2f   : > { %625 = vmatpush.msrb.mxu1 %v275_v15 }
  0x98   : > { %v322_v18 = vpop.f32.mrf.mxu0 }
  0x99   : > { %v1395_v19 = vadd.f32 %v322_v18, %v293_v17 }
  0x9b   : > { %1013 = vmatmul.msk.f32.vlgmr.msra.gmra.mxu1 %vm332_vm1, %v1395_v19  ;;  %v374_v20 = vmul.f32 %v1395_v19, %v1395_v19 }
  0x9d   : > { %1017 = vmatmul.msk.f32.vlgmr.msra.gmra.mxu2 %vm332_vm1, %v374_v20 }
  0xa0   : > { %v324_v21 = vpop.f32.mrf.mxu0 }
  0xa1   : > { %v1402_v22 = vadd.f32 %v324_v21, %v293_v17 }
  0xa3   : > { %1014 = vmatmul.msk.f32.gmra.mxu1 %vm332_vm1, %v1402_v22  ;;  %v375_v23 = vmul.f32 %v1402_v22, %v1402_v22 }
  0xa5   : > { %1018 = vmatmul.msk.f32.gmra.mxu2 %vm332_vm1, %v375_v23 }
  0xa8   : > { %v327_v24 = vpop.f32.mrf.mxu0 }
  0xa9   : > { %v1409_v25 = vadd.f32 %v327_v24, %v293_v17 }
  0xab   : > { %1015 = vmatmul.msk.f32.vlgmr.msra.gmra.mxu3 %vm332_vm1, %v1409_v25  ;;  %v376_v26 = vmul.f32 %v1409_v25, %v1409_v25 }
  0xad   : > { %1019 = vmatmul.msk.f32.gmra.mxu2 %vm332_vm1, %v376_v26 }
  0xb0   : > { %v329_v27 = vpop.f32.mrf.mxu0 }
  0xb1   : > { %v1416_v28 = vadd.f32 %v329_v27, %v293_v17 }
  0xb3   : > { %1016 = vmatmul.msk.f32.gmra.mxu3 %vm332_vm1, %v1416_v28  ;;  %v377_v29 = vmul.f32 %v1416_v28, %v1416_v28 }
  0xb5   : > { %1020 = vmatmul.msk.f32.gmra.mxu2 %vm332_vm1, %v377_v29 }
 0x118   : > { %v362_v31 = vpop.f32.mrf.mxu1 }
 0x119   : > { %v419_v33 = vmul.f32 %v362_v31, %v362_v31  ;;  %v471_v60 = vsub.f32 %v1395_v19, %v362_v31 }
 0x120   : > { %v407_v34 = vpop.f32.mrf.mxu2  ;;  %v365_v38 = vpop.f32.mrf.mxu1 }
 0x121   : > { %v423_v36 = vsub.f32 %v407_v34, %v419_v33  ;;  %v420_v40 = vmul.f32 %v365_v38, %v365_v38  ;;  %v472_v8 = vsub.f32 %v1402_v22, %v365_v38 }
 0x123   : > { %v427_v37 = vadd.f32 1e-05, %v423_v36 }
 0x125   : > { %1181 = vrsqrt.f32 %v427_v37  ;;  %vm437_vm3 = vweird.f32 %v427_v37 }
 0x128   : > { %v410_v41 = vpop.f32.mrf.mxu2 }
 0x129   : > { %v424_v42 = vsub.f32 %v410_v41, %v420_v40 }
 0x12b   : > { %v1182_v43 = vpop.eup %1181  ;;  %v428_v44 = vadd.f32 1e-05, %v424_v42 }
 0x12c   : > { %v432_v45 = vmul.f32 %v1182_v43, %v427_v37  ;;  %vm438_vm2 = vweird.f32 %v1182_v43 }
 0x12d   : > { %1183 = vrsqrt.f32 %v428_v44  ;;  %vm439_vm4 = vmor %vm437_vm3, %vm438_vm2  ;;  %vm447_vm6 = vweird.f32 %v428_v44 }
 0x12e   : > { %v433_v46 = vmul.f32 %v1182_v43, %v432_v45  ;;  %v368_v47 = vpop.f32.mrf.mxu3 }
 0x12f   : > { %v421_v48 = vmul.f32 %v368_v47, %v368_v47  ;;  %v473_v29 = vsub.f32 %v1409_v25, %v368_v47 }
 0x130   : > { %v434_v49 = vmul.f32 0.5, %v433_v46  ;;  %v413_v50 = vpop.f32.mrf.mxu2 }
 0x131   : > { %v425_v51 = vsub.f32 %v413_v50, %v421_v48 }
 0x132   : > { %v435_v52 = vsub.f32 1.5, %v434_v49 }
 0x133   : > { %v1184_v53 = vpop.eup %1183  ;;  %v429_v54 = vadd.f32 1e-05, %v425_v51 }
 0x134   : > { %v436_v55 = vmul.f32 %v1182_v43, %v435_v52  ;;  %v442_v56 = vmul.f32 %v1184_v53, %v428_v44  ;;  %vm448_vm5 = vweird.f32 %v1184_v53  ;;  %v503_v44 = vperm.slane %v1392_v16, 3 }
 0x135   : > { %1185 = vrsqrt.f32 %v429_v54  ;;  %vm449_vm7 = vmor %vm447_vm6, %vm448_vm5  ;;  %vm457_vm9 = vweird.f32 %v429_v54 }
 0x136   : > { %v440_v57 = vsel %vm439_vm4, %v1182_v43, %v436_v55  ;;  %v443_v58 = vmul.f32 %v1184_v53, %v442_v56  ;;  %v371_v59 = vpop.f32.mrf.mxu3  ;;  %v720_v56 = vld [vmem:[%s1574_s4 + $0x38] sm:$0xff] }
 0x137   : > { %v422_v61 = vmul.f32 %v371_v59, %v371_v59  ;;  %v475_v0 = vmul.f32 %v471_v60, %v440_v57  ;;  %v474_v35 = vsub.f32 %v1416_v28, %v371_v59  ;;  %1085 = vmatpush.msrb.mxu2 %v720_v56  ;;  %742 = vmatpush.msra.mxu1 %v720_v56  ;;  %v719_v57 = vld [vmem:[%s1574_s4 + $0x30] sm:$0xff]  ;;  %v717_v59 = vld [vmem:[%s1574_s4 + $0x20] sm:$0xff]  ;;  %v716_v60 = vld [vmem:[%s1574_s4 + $0x18] sm:$0xff] }
 0x138   : > { %v444_v62 = vmul.f32 0.5, %v443_v58  ;;  %v416_v63 = vpop.f32.mrf.mxu2  ;;  %v718_v58 = vld [vmem:[%s1574_s4 + $0x28] sm:$0xff] }
 0x139   : > { %v426_v2 = vsub.f32 %v416_v63, %v422_v61  ;;  %v480_v9 = vmul.f32 %v479_v1, %v475_v0  ;;  %1086 = vmatpush.msrb.mxu2 %v719_v57  ;;  %743 = vmatpush.msra.mxu1 %v719_v57  ;;  %v715_v61 = vld [vmem:[%s1574_s4 + $0x10] sm:$0xff]  ;;  %v713_v63 = vld [vmem:[%s1574_s4] sm:$0xff] }
 0x13a   : > { %v445_v3 = vsub.f32 1.5, %v444_v62  ;;  %v714_v62 = vld [vmem:[%s1574_s4 + $0x8] sm:$0xff] }
 0x13b   : > { %v1186_v4 = vpop.eup %1185  ;;  %v430_v5 = vadd.f32 1e-05, %v426_v2  ;;  %v485_v17 = vadd.f32 %v484_v10, %v480_v9  ;;  %1087 = vmatpush.msrb.mxu2 %v718_v58  ;;  %744 = vmatpush.msra.mxu1 %v718_v58 }
 0x13c   : > { %v446_v6 = vmul.f32 %v1184_v53, %v445_v3  ;;  %v452_v7 = vmul.f32 %v1186_v4, %v429_v54  ;;  %vm458_vm8 = vweird.f32 %v1186_v4 }
 0x13d   : > { %1187 = vrsqrt.f32 %v430_v5  ;;  %vm459_vm10 = vmor %vm457_vm9, %vm458_vm8  ;;  %v489_v22 = vmax.f32 %v485_v17, 0.0  ;;  %vm467_vm12 = vweird.f32 %v430_v5  ;;  %1088 = vmatpush.msrb.mxu2 %v717_v59  ;;  %745 = vmatpush.msra.mxu1 %v717_v59 }
 0x13e   : > { %v450_v11 = vsel %vm449_vm7, %v1184_v53, %v446_v6  ;;  %v453_v12 = vmul.f32 %v1186_v4, %v452_v7 }
 0x13f   : > { %v476_v13 = vmul.f32 %v472_v8, %v450_v11  ;;  %1089 = vmatpush.msrb.mxu2 %v716_v60  ;;  %746 = vmatpush.msra.mxu1 %v716_v60 }
 0x140   : > { %v454_v14 = vmul.f32 0.5, %v453_v12 }
 0x141   : > { %v481_v15 = vmul.f32 %v479_v1, %v476_v13  ;;  %747 = vmatpush.msra.mxu1 %v715_v61  ;;  %1090 = vmatpush.msrb.mxu2 %v715_v61 }
 0x142   : > { %v455_v18 = vsub.f32 1.5, %v454_v14 }
 0x143   : > { %v1188_v19 = vpop.eup %1187  ;;  %v486_v20 = vadd.f32 %v484_v10, %v481_v15  ;;  %748 = vmatpush.msra.mxu1 %v714_v62  ;;  %1091 = vmatpush.msrb.mxu2 %v714_v62 }
 0x144   : > { %v456_v21 = vmul.f32 %v1186_v4, %v455_v18  ;;  %v462_v23 = vmul.f32 %v1188_v19, %v430_v5  ;;  %vm468_vm11 = vweird.f32 %v1188_v19 }
 0x145   : > { %v490_v24 = vmax.f32 %v486_v20, 0.0  ;;  %vm469_vm13 = vmor %vm467_vm12, %vm468_vm11  ;;  %749 = vmatpush.msra.mxu1 %v713_v63  ;;  %1092 = vmatpush.msrb.mxu2 %v713_v63  ;;  %vm763_vm11 = vcmask 7168  }
 0x146   : > { %v460_v26 = vsel %vm459_vm10, %v1186_v4, %v456_v21  ;;  %v463_v27 = vmul.f32 %v1188_v19, %v462_v23 }
 0x147   : > { %v493_v30 = vpack.c.bf16 %v490_v24, %v489_v22  ;;  %v477_v32 = vmul.f32 %v473_v29, %v460_v26  ;;  %v699_v26 = vperm.slane %v1392_v16, 4 }
 0x148   : > { %v464_v31 = vmul.f32 0.5, %v463_v27 }
 0x149   : > { %1037 = vmatmul.msk.bf16.vlgmr.msrb.gmra.mxu3 %vm332_vm1, %v493_v30  ;;  %v482_v36 = vmul.f32 %v479_v1, %v477_v32 }
 0x14a   : > { %v465_v33 = vsub.f32 1.5, %v464_v31 }
 0x14b   : > { %v487_v40 = vadd.f32 %v484_v10, %v482_v36 }
 0x14c   : > { %v466_v34 = vmul.f32 %v1188_v19, %v465_v33  ;;  %v704_v33 = vperm.slane %v1392_v16, 5 }
 0x14d   : > { %v491_v42 = vmax.f32 %v487_v40, 0.0 }
 0x14e   : > { %v470_v37 = vsel %vm469_vm13, %v1188_v19, %v466_v34 }
 0x14f   : > { %v478_v38 = vmul.f32 %v474_v35, %v470_v37 }
 0x151   : > { %v483_v39 = vmul.f32 %v479_v1, %v478_v38 }
 0x153   : > { %v488_v41 = vadd.f32 %v484_v10, %v483_v39 }
 0x155   : > { %v492_v25 = vmax.f32 %v488_v41, 0.0 }
 0x157   : > { %v494_v43 = vpack.c.bf16 %v492_v25, %v491_v42 }
 0x159   : > { %1038 = vmatmul.msk.bf16.gmra.mxu3 %vm332_vm1, %v494_v43 }
 0x1cc   : > { %v543_v45 = vpop.f32.mrf.mxu3 }
 0x1cd   : > { %v1444_v46 = vadd.f32 %v543_v45, %v503_v44 }
 0x1cf   : > { %v594_v28 = vmul.f32 %v1444_v46, %v1444_v46  ;;  %1039 = vmatmul.msk.f32.vlgmr.msrb.gmra.mxu0 %vm332_vm1, %v1444_v46 }
 0x1d1   : > { %1043 = vmatmul.msk.f32.vlgmr.msrb.gmra.mxu1 %vm332_vm1, %v594_v28 }
 0x1d4   : > { %v545_v47 = vpop.f32.mrf.mxu3 }
 0x1d5   : > { %v1451_v48 = vadd.f32 %v545_v47, %v503_v44 }
 0x1d7   : > { %1040 = vmatmul.msk.f32.gmra.mxu0 %vm332_vm1, %v1451_v48  ;;  %v595_v49 = vmul.f32 %v1451_v48, %v1451_v48 }
 0x1d9   : > { %1044 = vmatmul.msk.f32.gmra.mxu1 %vm332_vm1, %v595_v49 }
 0x1dc   : > { %v548_v50 = vpop.f32.mrf.mxu3 }
 0x1dd   : > { %v1458_v51 = vadd.f32 %v548_v50, %v503_v44 }
 0x1df   : > { %1041 = vmatmul.msk.f32.gmra.mxu0 %vm332_vm1, %v1458_v51  ;;  %v596_v52 = vmul.f32 %v1458_v51, %v1458_v51 }
 0x1e1   : > { %1045 = vmatmul.msk.f32.gmra.mxu1 %vm332_vm1, %v596_v52 }
 0x1e4   : > { %v550_v53 = vpop.f32.mrf.mxu3 }
 0x1e5   : > { %v1465_v54 = vadd.f32 %v550_v53, %v503_v44 }
 0x1e7   : > { %1042 = vmatmul.msk.f32.gmra.mxu0 %vm332_vm1, %v1465_v54  ;;  %v597_v55 = vmul.f32 %v1465_v54, %v1465_v54 }
 0x1e9   : > { %1046 = vmatmul.msk.f32.gmra.mxu1 %vm332_vm1, %v597_v55 }
 0x24c   : > { %v582_v0 = vpop.f32.mrf.mxu0 }
 0x24d   : > { %v639_v1 = vmul.f32 %v582_v0, %v582_v0  ;;  %v691_v24 = vsub.f32 %v1444_v46, %v582_v0 }
 0x24e   : > { %v627_v2 = vpop.f32.mrf.mxu1 }
 0x24f   : > { %v643_v3 = vsub.f32 %v627_v2, %v639_v1 }
 0x251   : > { %v647_v4 = vadd.f32 1e-05, %v643_v3 }
 0x253   : > { %1189 = vrsqrt.f32 %v647_v4  ;;  %vm657_vm15 = vweird.f32 %v647_v4 }
 0x254   : > { %v585_v5 = vpop.f32.mrf.mxu0 }
 0x255   : > { %v640_v6 = vmul.f32 %v585_v5, %v585_v5  ;;  %v692_v43 = vsub.f32 %v1451_v48, %v585_v5 }
 0x256   : > { %v630_v7 = vpop.f32.mrf.mxu1 }
 0x257   : > { %v644_v8 = vsub.f32 %v630_v7, %v640_v6 }
 0x259   : > { %v1190_v9 = vpop.eup %1189  ;;  %v648_v10 = vadd.f32 1e-05, %v644_v8  ;;  %v721_v8 = vperm.slane %v1392_v16, 6 }
 0x25a   : > { %v652_v11 = vmul.f32 %v1190_v9, %v647_v4  ;;  %vm658_vm14 = vweird.f32 %v1190_v9 }
 0x25b   : > { %1191 = vrsqrt.f32 %v648_v10  ;;  %vm659_vm0 = vmor %vm657_vm15, %vm658_vm14  ;;  %vm667_vm3 = vweird.f32 %v648_v10 }
 0x25c   : > { %v653_v12 = vmul.f32 %v1190_v9, %v652_v11  ;;  %v588_v13 = vpop.f32.mrf.mxu0 }
 0x25d   : > { %v641_v14 = vmul.f32 %v588_v13, %v588_v13  ;;  %v693_v57 = vsub.f32 %v1458_v51, %v588_v13 }
 0x25e   : > { %v654_v15 = vmul.f32 0.5, %v653_v12  ;;  %v633_v17 = vpop.f32.mrf.mxu1 }
 0x25f   : > { %v645_v18 = vsub.f32 %v633_v17, %v641_v14 }
 0x260   : > { %v655_v19 = vsub.f32 1.5, %v654_v15 }
 0x261   : > { %v1192_v20 = vpop.eup %1191  ;;  %v649_v21 = vadd.f32 1e-05, %v645_v18 }
 0x262   : > { %v656_v23 = vmul.f32 %v1190_v9, %v655_v19  ;;  %v662_v22 = vmul.f32 %v1192_v20, %v648_v10  ;;  %vm668_vm2 = vweird.f32 %v1192_v20 }
 0x263   : > { %1193 = vrsqrt.f32 %v649_v21  ;;  %vm669_vm4 = vmor %vm667_vm3, %vm668_vm2  ;;  %vm677_vm6 = vweird.f32 %v649_v21 }
 0x264   : > { %v660_v27 = vsel %vm659_vm0, %v1190_v9, %v656_v23  ;;  %v663_v29 = vmul.f32 %v1192_v20, %v662_v22  ;;  %v591_v30 = vpop.f32.mrf.mxu0 }
 0x265   : > { %v695_v31 = vmul.f32 %v691_v24, %v660_v27  ;;  %v642_v32 = vmul.f32 %v591_v30, %v591_v30  ;;  %v694_v2 = vsub.f32 %v1465_v54, %v591_v30 }
 0x266   : > { %v664_v34 = vmul.f32 0.5, %v663_v29  ;;  %v636_v35 = vpop.f32.mrf.mxu1 }
 0x267   : > { %v700_v36 = vmul.f32 %v699_v26, %v695_v31  ;;  %v646_v37 = vsub.f32 %v636_v35, %v642_v32 }
 0x268   : > { %v665_v38 = vsub.f32 1.5, %v664_v34 }
 0x269   : > { %v1194_v39 = vpop.eup %1193  ;;  %v650_v40 = vadd.f32 1e-05, %v646_v37  ;;  %v705_v41 = vadd.f32 %v704_v33, %v700_v36 }
 0x26a   : > { %v666_v42 = vmul.f32 %v1192_v20, %v665_v38  ;;  %v672_v25 = vmul.f32 %v1194_v39, %v649_v21  ;;  %vm678_vm5 = vweird.f32 %v1194_v39 }
 0x26b   : > { %1195 = vrsqrt.f32 %v650_v40  ;;  %v709_v44 = vmax.f32 %v705_v41, 0.0  ;;  %vm679_vm7 = vmor %vm677_vm6, %vm678_vm5  ;;  %vm687_vm9 = vweird.f32 %v650_v40 }
 0x26c   : > { %v670_v45 = vsel %vm669_vm4, %v1192_v20, %v666_v42  ;;  %v673_v46 = vmul.f32 %v1194_v39, %v672_v25 }
 0x26d   : > { %v696_v28 = vmul.f32 %v692_v43, %v670_v45  ;;  %1047 = vmatmul.msk.f32.vlgmr.msra.gmra.mxu1 %vm332_vm1, %v709_v44 }
 0x26e   : > { %v674_v47 = vmul.f32 0.5, %v673_v46 }
 0x26f   : > { %v701_v49 = vmul.f32 %v699_v26, %v696_v28 }
 0x270   : > { %v675_v50 = vsub.f32 1.5, %v674_v47 }
 0x271   : > { %v1196_v52 = vpop.eup %1195  ;;  %v706_v53 = vadd.f32 %v704_v33, %v701_v49 }
 0x272   : > { %v676_v55 = vmul.f32 %v1194_v39, %v675_v50  ;;  %v682_v56 = vmul.f32 %v1196_v52, %v650_v40  ;;  %vm688_vm8 = vweird.f32 %v1196_v52 }
 0x273   : > { %v710_v48 = vmax.f32 %v706_v53, 0.0  ;;  %vm689_vm10 = vmor %vm687_vm9, %vm688_vm8 }
 0x274   : > { %v680_v58 = vsel %vm679_vm7, %v1194_v39, %v676_v55  ;;  %v683_v59 = vmul.f32 %v1196_v52, %v682_v56 }
 0x275   : > { %1048 = vmatmul.msk.f32.vlgmr.msrb.gmra.mxu2 %vm332_vm1, %v710_v48  ;;  %v697_v60 = vmul.f32 %v693_v57, %v680_v58 }
 0x276   : > { %v684_v61 = vmul.f32 0.5, %v683_v59 }
 0x277   : > { %v702_v62 = vmul.f32 %v699_v26, %v697_v60 }
 0x278   : > { %v685_v63 = vsub.f32 1.5, %v684_v61 }
 0x279   : > { %v707_v0 = vadd.f32 %v704_v33, %v702_v62 }
 0x27a   : > { %v686_v1 = vmul.f32 %v1196_v52, %v685_v63 }
 0x27b   : > { %v711_v3 = vmax.f32 %v707_v0, 0.0 }
 0x27c   : > { %v690_v51 = vsel %vm689_vm10, %v1196_v52, %v686_v1 }
 0x27d   : > { %1049 = vmatmul.msk.f32.gmra.mxu2 %vm332_vm1, %v711_v3  ;;  %v698_v4 = vmul.f32 %v694_v2, %v690_v51 }
 0x27f   : > { %v703_v5 = vmul.f32 %v699_v26, %v698_v4 }
 0x281   : > { %v708_v6 = vadd.f32 %v704_v33, %v703_v5 }
 0x283   : > { %v712_v7 = vmax.f32 %v708_v6, 0.0 }
 0x285   : > { %1050 = vmatmul.msk.f32.gmra.mxu2 %vm332_vm1, %v712_v7 }
 0x2ea   : > { %v751_v9 = vpop.f32.mrf.mxu1 }
 0x2eb   : > { %v752_v10 = vadd.f32 %v751_v9, %v721_v8 }
 0x2ed   : > { %764 = vst.msk [vmem:[%s1508_s9] sm:$0xff] %vm763_vm11, %v752_v10 }
 0x2f8   : > { %v754_v54 = vpop.f32.mrf.mxu2 }
 0x2f9   : > { %v755_v11 = vadd.f32 %v754_v54, %v721_v8 }
 0x2fb   : > { %765 = vst.msk [vmem:[%s1508_s9 + $0x8] sm:$0xff] %vm763_vm11, %v755_v11 }
 0x300   : > { %v757_v12 = vpop.f32.mrf.mxu2 }
 0x301   : > { %v758_v13 = vadd.f32 %v757_v12, %v721_v8 }
 0x303   : > { %766 = vst.msk [vmem:[%s1508_s9 + $0x10] sm:$0xff] %vm763_vm11, %v758_v13 }
 0x307   : > { %774 = sbr.rel (!%p1345_p4) target bundleno = 819 (0x333), region = 48 }
 0x308   : > { %v760_v14 = vpop.f32.mrf.mxu2 }
 0x309   : > { %v761_v15 = vadd.f32 %v760_v14, %v721_v8 }
 0x30b   : > { %767 = vst.msk [vmem:[%s1508_s9 + $0x18] sm:$0xff] %vm763_vm11, %v761_v15 }
 0x30c   : > { %s1585_s21 = smov (!%p777_p8, %s776_s21), 4 }
 0x30d   : > { %s1053_s14 = sshll.u32 %s1585_s21, 3 }
 0x30e   : > { %p1056_p9 = scmp.eq.s32.totalorder %s1053_s14, 0 }
 0x30f   : > { %s1527_s15 = sshrl.u32 (!%p1056_p9), %s1585_s21, 2 }
 0x310   : > { %785 = sbr.rel (%p1056_p9) target bundleno = 819 (0x333), region = 52  ;;  %p1057_p10 = scmp.le.s32.totalorder (!%p1056_p9), %s1527_s15, 0 }
 0x315   : > { %952 = sbr.rel (%p1057_p10) target bundleno = 802 (0x322), region = 128  ;;  %s1578_s24 = smov (!%p1057_p10), %s1521_s13 }
 0x316   : > { %s1579_s29 = smov (!%p1057_p10), %s1508_s9  ;;  %s1536_s8 = smov (!%p1057_p10), 0  }
 0x317   : > { %s1265_s16 = smov (!%p1057_p10), 0  }
 0x31a LB: >> { %v854_v16 = vld [vmem:[%s1259_s29] sm:$0xff]  ;;  %v856_v17 = vld [vmem:[%s1259_s29 + $0x8] sm:$0xff]  ;;  %v858_v18 = vld [vmem:[%s1259_s29 + $0x10] sm:$0xff]  ;;  %s862_s17 = sadd.s32 1, %s1263_s8  ;;  %s848_s16 = sadd.s32 1, %s1267_s16   ;;  %s1267_s16 = sphi %s1265_s16, %s848_s16   ;;  %s1263_s8 = sphi %s1536_s8, %s1580_s8   ;;  %s1259_s29 = sphi %s1579_s29, %s867_s29   ;;  %s1255_s24 = sphi %s1578_s24, %s868_s24  }
 0x31b   : >> { %855 = vst [vmem:[%s1255_s24] sm:$0xff] %v854_v16  ;;  %v860_v19 = vld [vmem:[%s1259_s29 + $0x18] sm:$0xff]  ;;  %p863_p11 = scmp.ge.s32.totalorder %s862_s17, %s1527_s15  ;;  %p847_p12 = scmp.ge.s32.totalorder %s848_s16, %s1527_s15 }
 0x31c   : >> { %857 = vst [vmem:[%s1255_s24 + $0x8] sm:$0xff] %v856_v17 }
 0x31d   : >> { %859 = vst [vmem:[%s1255_s24 + $0x10] sm:$0xff] %v858_v18  ;;  %s1587_s17 = smov (%p863_p11, %s862_s17), 0  ;;  %850 = sbr.rel (!%p847_p12) target bundleno = 794 (0x31a), region = 134 }
 0x31e   : >> { %861 = vst [vmem:[%s1255_s24 + $0x18] sm:$0xff] %v860_v19  ;;  %s1058_s18 = sshll.u32 %s1587_s17, 5  ;;  %s1580_s8 = smov %s1587_s17 }
 0x31f   : >> { %s867_s29 = scalar_lea.vmem %s1508_s9, %s1058_s18 [#allocation2]   ;;  %s868_s24 = scalar_lea.vmem %s1521_s13, %s1058_s18  }
 0x322 PF: > { %s1552_s19 = sand.u32 3, %s1585_s21   ;;  %s1075_s20 = sshll.u32 %s1527_s15, 5 }
 0x323   : > { %s873_s23 = scalar_lea.vmem %s1508_s9, %s1075_s20 [#allocation2]   ;;  %s875_s26 = scalar_lea.vmem %s1521_s13, %s1075_s20  }
 0x324   : > { %p1063_p13 = scmp.le.s32.totalorder %s1552_s19, 0 }
 0x325   : > { %s1269_s27 = smov (!%p1063_p13), %s875_s26   ;;  %s1273_s30 = smov (!%p1063_p13), %s873_s23  }
 0x326   : > { %966 = sbr.rel (%p1063_p13) target bundleno = 819 (0x333), region = 139  ;;  %s1277_s7 = smov (!%p1063_p13), 0  }
 0x327   : > { %s1281_s10 = smov (!%p1063_p13), 0  }
 0x32b LB: >> { %v885_v20 = vld [vmem:[%s1275_s30] sm:$0xff]  ;;  %s887_s21 = sadd.s32 1, %s1279_s7  ;;  %s879_s10 = sadd.s32 1, %s1283_s10   ;;  %s1283_s10 = sphi %s1281_s10, %s879_s10   ;;  %s1279_s7 = sphi %s1277_s7, %s1278_s7   ;;  %s1275_s30 = sphi %s1273_s30, %s892_s30   ;;  %s1271_s27 = sphi %s1269_s27, %s893_s27  }
 0x32c   : >> { %886 = vst [vmem:[%s1271_s27] sm:$0xff] %v885_v20  ;;  %p888_p0 = scmp.ge.s32.totalorder %s887_s21, %s1552_s19  ;;  %p878_p1 = scmp.ge.s32.totalorder %s879_s10, %s1552_s19 }
 0x32e   : >> { %s1589_s21 = smov (%p888_p0, %s887_s21), 0  ;;  %881 = sbr.rel (!%p878_p1) target bundleno = 811 (0x32b), region = 145 }
 0x32f   : >> { %s1064_s9 = sshll.u32 %s1589_s21, 3  ;;  %s1278_s7 = smov %s1589_s21  }
 0x330   : >> { %s892_s30 = scalar_lea.vmem %s873_s23, %s1064_s9 [#allocation2]   ;;  %s893_s27 = scalar_lea.vmem %s875_s26, %s1064_s9  }
 0x333 PF: > { %p13_p2 = scmp.ge.s32.totalorder %s1335_s25, 9   ;;  %s1581_s21 = smov %s1247_s22 }
 0x334   : > { %s1582_s22 = smov %s1343_s28  ;;  %s1583_s23 = smov %s1335_s25 }
 0x335   :  { %15 = sbr.rel (!%p13_p2) target bundleno = 2 (0x2), region = 156 }

</bundles_post_ra>
